<compile_context>
chip_gen: v6e
topology: v6e:2x2x1
jax: 0.10.0
libtpu: 0.0.40
codegen_flags: <defaults>
</compile_context>

<pallas_src>
import functools

import jax
import jax.numpy as jnp
from jax.experimental import pallas as pl
from jax.experimental.pallas import tpu as pltpu


def _sigmoid(v):
    return 1.0 / (1.0 + jnp.exp(-v))


def _swish(v):
    return v * _sigmoid(v)


def _masked_batchnorm(z, gamma, beta, row_mask, inv_b, eps):
    # Training-mode BatchNorm1d: biased variance over the (real) batch rows.
    zm = jnp.where(row_mask, z, 0.0)
    mean = jnp.sum(zm, axis=0, keepdims=True) * inv_b
    d = jnp.where(row_mask, z - mean, 0.0)
    var = jnp.sum(d * d, axis=0, keepdims=True) * inv_b
    return (z - mean) * (gamma * jax.lax.rsqrt(var + eps)) + beta


def _decoder_block_kernel(b_real, eps,
                          x_ref,
                          w1_ref, b1_ref, g1_ref, be1_ref,
                          w2_ref, b2_ref, g2_ref, be2_ref,
                          w3_ref, b3_ref, g3_ref, be3_ref,
                          sw1_ref, sw2_ref,
                          o_ref):
    x = x_ref[...]                                   # (Bp, Dp) f32
    bp = x.shape[0]
    row_mask = jax.lax.broadcasted_iota(jnp.int32, (bp, 1), 0) < b_real
    inv_b = 1.0 / b_real

    # fc1 -> BN1 (batch stats) -> Swish
    z1 = jnp.dot(x, w1_ref[...], preferred_element_type=jnp.float32) + b1_ref[...]
    a1 = _swish(_masked_batchnorm(z1, g1_ref[...], be1_ref[...], row_mask, inv_b, eps))

    # fc2 -> BN2 -> Swish
    z2 = jnp.dot(a1, w2_ref[...], preferred_element_type=jnp.float32) + b2_ref[...]
    a2 = _swish(_masked_batchnorm(z2, g2_ref[...], be2_ref[...], row_mask, inv_b, eps))

    # fc3 -> BN3
    z3 = jnp.dot(a2, w3_ref[...], preferred_element_type=jnp.float32) + b3_ref[...]
    h = _masked_batchnorm(z3, g3_ref[...], be3_ref[...], row_mask, inv_b, eps)

    # SELayer on a (B, dim) tensor: avg-pool over trailing length 1 is identity.
    s1 = jnp.maximum(jnp.dot(h, sw1_ref[...], preferred_element_type=jnp.float32), 0.0)
    gate = _sigmoid(jnp.dot(s1, sw2_ref[...], preferred_element_type=jnp.float32))

    # Residual: x + 0.1 * (SE-gated h).  Output tile is lane-dense (Dp % 128 == 0).
    o_ref[...] = x + 0.1 * (h * gate)


def _round_up(n, m):
    return ((n + m - 1) // m) * m


def decoder_residual_block(x, params, *, eps=1e-5):
    """x: (B, dim) f32.  params: weights in (in, out) layout, biases/gamma/beta 1-D."""
    (w1, b1, g1, be1,
     w2, b2, g2, be2,
     w3, b3, g3, be3,
     sw1, sw2) = params

    B, D = x.shape
    GD = w1.shape[1]
    Hse = sw1.shape[1]

    Bp = _round_up(B, 8)
    Dp = _round_up(D, 128)
    GDp = _round_up(GD, 128)
    Hp = _round_up(Hse, 128)

    f32 = jnp.float32

    def pad2(a, r, c):
        a = a.astype(f32)
        return jnp.pad(a, ((0, r - a.shape[0]), (0, c - a.shape[1])))

    def pad_row(a, c):
        a = a.astype(f32).reshape(1, -1)
        return jnp.pad(a, ((0, 0), (0, c - a.shape[1])))

    xp = pad2(x, Bp, Dp)
    w1p, b1p, g1p, be1p = pad2(w1, Dp, GDp), pad_row(b1, GDp), pad_row(g1, GDp), pad_row(be1, GDp)
    w2p, b2p, g2p, be2p = pad2(w2, GDp, GDp), pad_row(b2, GDp), pad_row(g2, GDp), pad_row(be2, GDp)
    w3p, b3p, g3p, be3p = pad2(w3, GDp, Dp), pad_row(b3, Dp), pad_row(g3, Dp), pad_row(be3, Dp)
    sw1p, sw2p = pad2(sw1, Dp, Hp), pad2(sw2, Hp, Dp)

    kernel = functools.partial(_decoder_block_kernel, int(B), float(eps))

    def full(shape):
        return pl.BlockSpec(shape, lambda i, _s=shape: (0,) * len(_s))

    out = pl.pallas_call(
        kernel,
        out_shape=jax.ShapeDtypeStruct((Bp, Dp), f32),
        grid_spec=pltpu.PrefetchScalarGridSpec(
            num_scalar_prefetch=0,
            grid=(1,),  # BN needs full-batch stats -> whole batch resident in VMEM
            in_specs=[
                full((Bp, Dp)),
                full((Dp, GDp)), full((1, GDp)), full((1, GDp)), full((1, GDp)),
                full((GDp, GDp)), full((1, GDp)), full((1, GDp)), full((1, GDp)),
                full((GDp, Dp)), full((1, Dp)), full((1, Dp)), full((1, Dp)),
                full((Dp, Hp)), full((Hp, Dp)),
            ],
            out_specs=full((Bp, Dp)),
        ),
        compiler_params=pltpu.CompilerParams(
            dimension_semantics=("arbitrary",),
            vmem_limit_bytes=48 * 1024 * 1024,  # safe on v5e/v6e (128 MiB) and v7x (64 MiB)
        ),
    )(xp,
      w1p, b1p, g1p, be1p,
      w2p, b2p, g2p, be2p,
      w3p, b3p, g3p, be3p,
      sw1p, sw2p)

    return out[:B, :D]


def _reference(x, params, eps=1e-5):
    # Pure-JAX mirror of the PyTorch forward (training-mode BatchNorm1d).
    (w1, b1, g1, be1,
     w2, b2, g2, be2,
     w3, b3, g3, be3,
     sw1, sw2) = params

    def bn(z, gamma, beta):
        mean = jnp.mean(z, axis=0, keepdims=True)
        var = jnp.var(z, axis=0, keepdims=True)  # biased, matches PyTorch BN normalization
        return (z - mean) / jnp.sqrt(var + eps) * gamma + beta

    def swish(v):
        return v * jax.nn.sigmoid(v)

    a1 = swish(bn(x @ w1 + b1, g1, be1))
    a2 = swish(bn(a1 @ w2 + b2, g2, be2))
    h = bn(a2 @ w3 + b3, g3, be3)
    gate = jax.nn.sigmoid(jnp.maximum(h @ sw1, 0.0) @ sw2)
    return x + 0.1 * (h * gate)


if __name__ == "__main__":
    key = jax.random.PRNGKey(0)
    keys = jax.random.split(key, 15)

    B, dim, n_group = 8, 32, 4
    GD = n_group * dim
    Hse = max(dim // 4, 4)  # SELayer hidden width

    def rnd(k, shape, scale=0.1):
        return scale * jax.random.normal(k, shape, dtype=jnp.float32)

    x = jax.random.normal(keys[0], (B, dim), dtype=jnp.float32)
    w1 = rnd(keys[1], (dim, GD));  b1 = rnd(keys[2], (GD,))
    g1 = 1.0 + rnd(keys[3], (GD,)); be1 = rnd(keys[4], (GD,))
    w2 = rnd(keys[5], (GD, GD));   b2 = rnd(keys[6], (GD,))
    g2 = 1.0 + rnd(keys[7], (GD,)); be2 = rnd(keys[8], (GD,))
    w3 = rnd(keys[9], (GD, dim));  b3 = rnd(keys[10], (dim,))
    g3 = 1.0 + rnd(keys[11], (dim,)); be3 = rnd(keys[12], (dim,))
    sw1 = rnd(keys[13], (dim, Hse))   # SE fc1 (no bias)
    sw2 = rnd(keys[14], (Hse, dim))   # SE fc2 (no bias)

    params = (w1, b1, g1, be1, w2, b2, g2, be2, w3, b3, g3, be3, sw1, sw2)

    out = decoder_residual_block(x, params)
    out = jax.block_until_ready(out)

    ref = _reference(x, params)
    assert out.shape == (B, dim), out.shape
    max_err = float(jnp.max(jnp.abs(out - ref)))
    assert jnp.allclose(out, ref, rtol=1e-3, atol=1e-3), max_err

    print("KERNEL_OK")
</pallas_src>

<mosaic_0001>
module attributes {stable_mosaic.version = 11 : i64} {
  func.func @_decoder_block_kernel(%arg0: i32, %arg1: memref<8x128xf32, #tpu.memory_space<vmem>>, %arg2: memref<128x128xf32, #tpu.memory_space<vmem>>, %arg3: memref<1x128xf32, #tpu.memory_space<vmem>>, %arg4: memref<1x128xf32, #tpu.memory_space<vmem>>, %arg5: memref<1x128xf32, #tpu.memory_space<vmem>>, %arg6: memref<128x128xf32, #tpu.memory_space<vmem>>, %arg7: memref<1x128xf32, #tpu.memory_space<vmem>>, %arg8: memref<1x128xf32, #tpu.memory_space<vmem>>, %arg9: memref<1x128xf32, #tpu.memory_space<vmem>>, %arg10: memref<128x128xf32, #tpu.memory_space<vmem>>, %arg11: memref<1x128xf32, #tpu.memory_space<vmem>>, %arg12: memref<1x128xf32, #tpu.memory_space<vmem>>, %arg13: memref<1x128xf32, #tpu.memory_space<vmem>>, %arg14: memref<128x128xf32, #tpu.memory_space<vmem>>, %arg15: memref<128x128xf32, #tpu.memory_space<vmem>>, %arg16: memref<8x128xf32, #tpu.memory_space<vmem>>) attributes {dimension_semantics = [#tpu.dimension_semantics<arbitrary>], iteration_bounds = array<i64: 1>, scalar_prefetch = 0 : i64, scratch_operands = 0 : i64, tpu.core_type = #tpu.core_type<tc>, window_params = [{pipeline_mode = #tpu.pipeline_mode<synchronous>, transform_indices = @transform_0, window_bounds = array<i64: 8, 128>}, {pipeline_mode = #tpu.pipeline_mode<synchronous>, transform_indices = @transform_1, window_bounds = array<i64: 128, 128>}, {pipeline_mode = #tpu.pipeline_mode<synchronous>, transform_indices = @transform_2, window_bounds = array<i64: 1, 128>}, {pipeline_mode = #tpu.pipeline_mode<synchronous>, transform_indices = @transform_3, window_bounds = array<i64: 1, 128>}, {pipeline_mode = #tpu.pipeline_mode<synchronous>, transform_indices = @transform_4, window_bounds = array<i64: 1, 128>}, {pipeline_mode = #tpu.pipeline_mode<synchronous>, transform_indices = @transform_5, window_bounds = array<i64: 128, 128>}, {pipeline_mode = #tpu.pipeline_mode<synchronous>, transform_indices = @transform_6, window_bounds = array<i64: 1, 128>}, {pipeline_mode = #tpu.pipeline_mode<synchronous>, transform_indices = @transform_7, window_bounds = array<i64: 1, 128>}, {pipeline_mode = #tpu.pipeline_mode<synchronous>, transform_indices = @transform_8, window_bounds = array<i64: 1, 128>}, {pipeline_mode = #tpu.pipeline_mode<synchronous>, transform_indices = @transform_9, window_bounds = array<i64: 128, 128>}, {pipeline_mode = #tpu.pipeline_mode<synchronous>, transform_indices = @transform_10, window_bounds = array<i64: 1, 128>}, {pipeline_mode = #tpu.pipeline_mode<synchronous>, transform_indices = @transform_11, window_bounds = array<i64: 1, 128>}, {pipeline_mode = #tpu.pipeline_mode<synchronous>, transform_indices = @transform_12, window_bounds = array<i64: 1, 128>}, {pipeline_mode = #tpu.pipeline_mode<synchronous>, transform_indices = @transform_13, window_bounds = array<i64: 128, 128>}, {pipeline_mode = #tpu.pipeline_mode<synchronous>, transform_indices = @transform_14, window_bounds = array<i64: 128, 128>}, {pipeline_mode = #tpu.pipeline_mode<synchronous>, transform_indices = @transform_15, window_bounds = array<i64: 8, 128>}]} {
    %c0 = arith.constant 0 : index
    %c0_0 = arith.constant 0 : index
    %0 = vector.load %arg1[%c0, %c0_0] : memref<8x128xf32, #tpu.memory_space<vmem>>, vector<8x128xf32>
    %1 = tpu.iota {dimensions = array<i32: 0>} : vector<8x1xi32>
    %c8_i32 = arith.constant 8 : i32
    %2 = vector.broadcast %c8_i32 : i32 to vector<8x1xi32>
    %3 = arith.cmpi slt, %1, %2 : vector<8x1xi32>
    %c0_1 = arith.constant 0 : index
    %c0_2 = arith.constant 0 : index
    %4 = vector.load %arg2[%c0_1, %c0_2] : memref<128x128xf32, #tpu.memory_space<vmem>>, vector<128x128xf32>
    %cst = arith.constant dense<0.000000e+00> : vector<8x128xf32>
    %5 = tpu.matmul %0, %4, %cst {dimension_numbers = #tpu.dot_dimension_numbers<[1], [0], [0], [1], [0, 0, 1, 1], [], []>} : vector<8x128xf32>, vector<128x128xf32>, vector<8x128xf32> -> vector<8x128xf32>
    %c0_3 = arith.constant 0 : index
    %c0_4 = arith.constant 0 : index
    %6 = vector.load %arg3[%c0_3, %c0_4] : memref<1x128xf32, #tpu.memory_space<vmem>>, vector<1x128xf32>
    %7 = vector.broadcast %6 : vector<1x128xf32> to vector<8x128xf32>
    %8 = arith.addf %5, %7 : vector<8x128xf32>
    %c0_5 = arith.constant 0 : index
    %c0_6 = arith.constant 0 : index
    %9 = vector.load %arg4[%c0_5, %c0_6] : memref<1x128xf32, #tpu.memory_space<vmem>>, vector<1x128xf32>
    %c0_7 = arith.constant 0 : index
    %c0_8 = arith.constant 0 : index
    %10 = vector.load %arg5[%c0_7, %c0_8] : memref<1x128xf32, #tpu.memory_space<vmem>>, vector<1x128xf32>
    %cst_9 = arith.constant 0.000000e+00 : f32
    %11 = vector.shape_cast %3 : vector<8x1xi1> to vector<8x1xi1>
    %12 = vector.broadcast %11 : vector<8x1xi1> to vector<8x128xi1>
    %13 = vector.broadcast %cst_9 : f32 to vector<8x128xf32>
    %14 = arith.select %12, %8, %13 : vector<8x128xi1>, vector<8x128xf32>
    %cst_10 = arith.constant dense<0.000000e+00> : vector<128xf32>
    %15 = vector.multi_reduction <add>, %14, %cst_10 [0] : vector<8x128xf32> to vector<128xf32>
    %16 = vector.shape_cast %15 : vector<128xf32> to vector<1x128xf32>
    %cst_11 = arith.constant 1.250000e-01 : f32
    %17 = vector.broadcast %cst_11 : f32 to vector<1x128xf32>
    %18 = arith.mulf %16, %17 : vector<1x128xf32>
    %19 = vector.broadcast %18 : vector<1x128xf32> to vector<8x128xf32>
    %20 = arith.subf %8, %19 : vector<8x128xf32>
    %cst_12 = arith.constant 0.000000e+00 : f32
    %21 = vector.shape_cast %3 : vector<8x1xi1> to vector<8x1xi1>
    %22 = vector.broadcast %21 : vector<8x1xi1> to vector<8x128xi1>
    %23 = vector.broadcast %cst_12 : f32 to vector<8x128xf32>
    %24 = arith.select %22, %20, %23 : vector<8x128xi1>, vector<8x128xf32>
    %25 = arith.mulf %24, %24 : vector<8x128xf32>
    %cst_13 = arith.constant dense<0.000000e+00> : vector<128xf32>
    %26 = vector.multi_reduction <add>, %25, %cst_13 [0] : vector<8x128xf32> to vector<128xf32>
    %27 = vector.shape_cast %26 : vector<128xf32> to vector<1x128xf32>
    %cst_14 = arith.constant 1.250000e-01 : f32
    %28 = vector.broadcast %cst_14 : f32 to vector<1x128xf32>
    %29 = arith.mulf %27, %28 : vector<1x128xf32>
    %30 = vector.broadcast %18 : vector<1x128xf32> to vector<8x128xf32>
    %31 = arith.subf %8, %30 : vector<8x128xf32>
    %cst_15 = arith.constant 9.99999974E-6 : f32
    %32 = vector.broadcast %cst_15 : f32 to vector<1x128xf32>
    %33 = arith.addf %29, %32 : vector<1x128xf32>
    %34 = math.rsqrt %33 : vector<1x128xf32>
    %35 = arith.mulf %9, %34 : vector<1x128xf32>
    %36 = vector.broadcast %35 : vector<1x128xf32> to vector<8x128xf32>
    %37 = arith.mulf %31, %36 : vector<8x128xf32>
    %38 = vector.broadcast %10 : vector<1x128xf32> to vector<8x128xf32>
    %39 = arith.addf %37, %38 : vector<8x128xf32>
    %cst_16 = arith.constant 0.000000e+00 : f32
    %40 = vector.broadcast %cst_16 : f32 to vector<8x128xf32>
    %41 = arith.subf %40, %39 : vector<8x128xf32>
    %42 = math.exp %41 : vector<8x128xf32>
    %cst_17 = arith.constant 1.000000e+00 : f32
    %43 = vector.broadcast %cst_17 : f32 to vector<8x128xf32>
    %44 = arith.addf %43, %42 : vector<8x128xf32>
    %cst_18 = arith.constant 1.000000e+00 : f32
    %45 = vector.broadcast %cst_18 : f32 to vector<8x128xf32>
    %46 = arith.divf %45, %44 : vector<8x128xf32>
    %47 = arith.mulf %39, %46 : vector<8x128xf32>
    %c0_19 = arith.constant 0 : index
    %c0_20 = arith.constant 0 : index
    %48 = vector.load %arg6[%c0_19, %c0_20] : memref<128x128xf32, #tpu.memory_space<vmem>>, vector<128x128xf32>
    %cst_21 = arith.constant dense<0.000000e+00> : vector<8x128xf32>
    %49 = tpu.matmul %47, %48, %cst_21 {dimension_numbers = #tpu.dot_dimension_numbers<[1], [0], [0], [1], [0, 0, 1, 1], [], []>} : vector<8x128xf32>, vector<128x128xf32>, vector<8x128xf32> -> vector<8x128xf32>
    %c0_22 = arith.constant 0 : index
    %c0_23 = arith.constant 0 : index
    %50 = vector.load %arg7[%c0_22, %c0_23] : memref<1x128xf32, #tpu.memory_space<vmem>>, vector<1x128xf32>
    %51 = vector.broadcast %50 : vector<1x128xf32> to vector<8x128xf32>
    %52 = arith.addf %49, %51 : vector<8x128xf32>
    %c0_24 = arith.constant 0 : index
    %c0_25 = arith.constant 0 : index
    %53 = vector.load %arg8[%c0_24, %c0_25] : memref<1x128xf32, #tpu.memory_space<vmem>>, vector<1x128xf32>
    %c0_26 = arith.constant 0 : index
    %c0_27 = arith.constant 0 : index
    %54 = vector.load %arg9[%c0_26, %c0_27] : memref<1x128xf32, #tpu.memory_space<vmem>>, vector<1x128xf32>
    %cst_28 = arith.constant 0.000000e+00 : f32
    %55 = vector.shape_cast %3 : vector<8x1xi1> to vector<8x1xi1>
    %56 = vector.broadcast %55 : vector<8x1xi1> to vector<8x128xi1>
    %57 = vector.broadcast %cst_28 : f32 to vector<8x128xf32>
    %58 = arith.select %56, %52, %57 : vector<8x128xi1>, vector<8x128xf32>
    %cst_29 = arith.constant dense<0.000000e+00> : vector<128xf32>
    %59 = vector.multi_reduction <add>, %58, %cst_29 [0] : vector<8x128xf32> to vector<128xf32>
    %60 = vector.shape_cast %59 : vector<128xf32> to vector<1x128xf32>
    %cst_30 = arith.constant 1.250000e-01 : f32
    %61 = vector.broadcast %cst_30 : f32 to vector<1x128xf32>
    %62 = arith.mulf %60, %61 : vector<1x128xf32>
    %63 = vector.broadcast %62 : vector<1x128xf32> to vector<8x128xf32>
    %64 = arith.subf %52, %63 : vector<8x128xf32>
    %cst_31 = arith.constant 0.000000e+00 : f32
    %65 = vector.shape_cast %3 : vector<8x1xi1> to vector<8x1xi1>
    %66 = vector.broadcast %65 : vector<8x1xi1> to vector<8x128xi1>
    %67 = vector.broadcast %cst_31 : f32 to vector<8x128xf32>
    %68 = arith.select %66, %64, %67 : vector<8x128xi1>, vector<8x128xf32>
    %69 = arith.mulf %68, %68 : vector<8x128xf32>
    %cst_32 = arith.constant dense<0.000000e+00> : vector<128xf32>
    %70 = vector.multi_reduction <add>, %69, %cst_32 [0] : vector<8x128xf32> to vector<128xf32>
    %71 = vector.shape_cast %70 : vector<128xf32> to vector<1x128xf32>
    %cst_33 = arith.constant 1.250000e-01 : f32
    %72 = vector.broadcast %cst_33 : f32 to vector<1x128xf32>
    %73 = arith.mulf %71, %72 : vector<1x128xf32>
    %74 = vector.broadcast %62 : vector<1x128xf32> to vector<8x128xf32>
    %75 = arith.subf %52, %74 : vector<8x128xf32>
    %cst_34 = arith.constant 9.99999974E-6 : f32
    %76 = vector.broadcast %cst_34 : f32 to vector<1x128xf32>
    %77 = arith.addf %73, %76 : vector<1x128xf32>
    %78 = math.rsqrt %77 : vector<1x128xf32>
    %79 = arith.mulf %53, %78 : vector<1x128xf32>
    %80 = vector.broadcast %79 : vector<1x128xf32> to vector<8x128xf32>
    %81 = arith.mulf %75, %80 : vector<8x128xf32>
    %82 = vector.broadcast %54 : vector<1x128xf32> to vector<8x128xf32>
    %83 = arith.addf %81, %82 : vector<8x128xf32>
    %cst_35 = arith.constant 0.000000e+00 : f32
    %84 = vector.broadcast %cst_35 : f32 to vector<8x128xf32>
    %85 = arith.subf %84, %83 : vector<8x128xf32>
    %86 = math.exp %85 : vector<8x128xf32>
    %cst_36 = arith.constant 1.000000e+00 : f32
    %87 = vector.broadcast %cst_36 : f32 to vector<8x128xf32>
    %88 = arith.addf %87, %86 : vector<8x128xf32>
    %cst_37 = arith.constant 1.000000e+00 : f32
    %89 = vector.broadcast %cst_37 : f32 to vector<8x128xf32>
    %90 = arith.divf %89, %88 : vector<8x128xf32>
    %91 = arith.mulf %83, %90 : vector<8x128xf32>
    %c0_38 = arith.constant 0 : index
    %c0_39 = arith.constant 0 : index
    %92 = vector.load %arg10[%c0_38, %c0_39] : memref<128x128xf32, #tpu.memory_space<vmem>>, vector<128x128xf32>
    %cst_40 = arith.constant dense<0.000000e+00> : vector<8x128xf32>
    %93 = tpu.matmul %91, %92, %cst_40 {dimension_numbers = #tpu.dot_dimension_numbers<[1], [0], [0], [1], [0, 0, 1, 1], [], []>} : vector<8x128xf32>, vector<128x128xf32>, vector<8x128xf32> -> vector<8x128xf32>
    %c0_41 = arith.constant 0 : index
    %c0_42 = arith.constant 0 : index
    %94 = vector.load %arg11[%c0_41, %c0_42] : memref<1x128xf32, #tpu.memory_space<vmem>>, vector<1x128xf32>
    %95 = vector.broadcast %94 : vector<1x128xf32> to vector<8x128xf32>
    %96 = arith.addf %93, %95 : vector<8x128xf32>
    %c0_43 = arith.constant 0 : index
    %c0_44 = arith.constant 0 : index
    %97 = vector.load %arg12[%c0_43, %c0_44] : memref<1x128xf32, #tpu.memory_space<vmem>>, vector<1x128xf32>
    %c0_45 = arith.constant 0 : index
    %c0_46 = arith.constant 0 : index
    %98 = vector.load %arg13[%c0_45, %c0_46] : memref<1x128xf32, #tpu.memory_space<vmem>>, vector<1x128xf32>
    %cst_47 = arith.constant 0.000000e+00 : f32
    %99 = vector.shape_cast %3 : vector<8x1xi1> to vector<8x1xi1>
    %100 = vector.broadcast %99 : vector<8x1xi1> to vector<8x128xi1>
    %101 = vector.broadcast %cst_47 : f32 to vector<8x128xf32>
    %102 = arith.select %100, %96, %101 : vector<8x128xi1>, vector<8x128xf32>
    %cst_48 = arith.constant dense<0.000000e+00> : vector<128xf32>
    %103 = vector.multi_reduction <add>, %102, %cst_48 [0] : vector<8x128xf32> to vector<128xf32>
    %104 = vector.shape_cast %103 : vector<128xf32> to vector<1x128xf32>
    %cst_49 = arith.constant 1.250000e-01 : f32
    %105 = vector.broadcast %cst_49 : f32 to vector<1x128xf32>
    %106 = arith.mulf %104, %105 : vector<1x128xf32>
    %107 = vector.broadcast %106 : vector<1x128xf32> to vector<8x128xf32>
    %108 = arith.subf %96, %107 : vector<8x128xf32>
    %cst_50 = arith.constant 0.000000e+00 : f32
    %109 = vector.shape_cast %3 : vector<8x1xi1> to vector<8x1xi1>
    %110 = vector.broadcast %109 : vector<8x1xi1> to vector<8x128xi1>
    %111 = vector.broadcast %cst_50 : f32 to vector<8x128xf32>
    %112 = arith.select %110, %108, %111 : vector<8x128xi1>, vector<8x128xf32>
    %113 = arith.mulf %112, %112 : vector<8x128xf32>
    %cst_51 = arith.constant dense<0.000000e+00> : vector<128xf32>
    %114 = vector.multi_reduction <add>, %113, %cst_51 [0] : vector<8x128xf32> to vector<128xf32>
    %115 = vector.shape_cast %114 : vector<128xf32> to vector<1x128xf32>
    %cst_52 = arith.constant 1.250000e-01 : f32
    %116 = vector.broadcast %cst_52 : f32 to vector<1x128xf32>
    %117 = arith.mulf %115, %116 : vector<1x128xf32>
    %118 = vector.broadcast %106 : vector<1x128xf32> to vector<8x128xf32>
    %119 = arith.subf %96, %118 : vector<8x128xf32>
    %cst_53 = arith.constant 9.99999974E-6 : f32
    %120 = vector.broadcast %cst_53 : f32 to vector<1x128xf32>
    %121 = arith.addf %117, %120 : vector<1x128xf32>
    %122 = math.rsqrt %121 : vector<1x128xf32>
    %123 = arith.mulf %97, %122 : vector<1x128xf32>
    %124 = vector.broadcast %123 : vector<1x128xf32> to vector<8x128xf32>
    %125 = arith.mulf %119, %124 : vector<8x128xf32>
    %126 = vector.broadcast %98 : vector<1x128xf32> to vector<8x128xf32>
    %127 = arith.addf %125, %126 : vector<8x128xf32>
    %c0_54 = arith.constant 0 : index
    %c0_55 = arith.constant 0 : index
    %128 = vector.load %arg14[%c0_54, %c0_55] : memref<128x128xf32, #tpu.memory_space<vmem>>, vector<128x128xf32>
    %cst_56 = arith.constant dense<0.000000e+00> : vector<8x128xf32>
    %129 = tpu.matmul %127, %128, %cst_56 {dimension_numbers = #tpu.dot_dimension_numbers<[1], [0], [0], [1], [0, 0, 1, 1], [], []>} : vector<8x128xf32>, vector<128x128xf32>, vector<8x128xf32> -> vector<8x128xf32>
    %cst_57 = arith.constant 0.000000e+00 : f32
    %130 = vector.broadcast %cst_57 : f32 to vector<8x128xf32>
    %131 = arith.maximumf %129, %130 : vector<8x128xf32>
    %c0_58 = arith.constant 0 : index
    %c0_59 = arith.constant 0 : index
    %132 = vector.load %arg15[%c0_58, %c0_59] : memref<128x128xf32, #tpu.memory_space<vmem>>, vector<128x128xf32>
    %cst_60 = arith.constant dense<0.000000e+00> : vector<8x128xf32>
    %133 = tpu.matmul %131, %132, %cst_60 {dimension_numbers = #tpu.dot_dimension_numbers<[1], [0], [0], [1], [0, 0, 1, 1], [], []>} : vector<8x128xf32>, vector<128x128xf32>, vector<8x128xf32> -> vector<8x128xf32>
    %cst_61 = arith.constant 0.000000e+00 : f32
    %134 = vector.broadcast %cst_61 : f32 to vector<8x128xf32>
    %135 = arith.subf %134, %133 : vector<8x128xf32>
    %136 = math.exp %135 : vector<8x128xf32>
    %cst_62 = arith.constant 1.000000e+00 : f32
    %137 = vector.broadcast %cst_62 : f32 to vector<8x128xf32>
    %138 = arith.addf %137, %136 : vector<8x128xf32>
    %cst_63 = arith.constant 1.000000e+00 : f32
    %139 = vector.broadcast %cst_63 : f32 to vector<8x128xf32>
    %140 = arith.divf %139, %138 : vector<8x128xf32>
    %141 = arith.mulf %127, %140 : vector<8x128xf32>
    %cst_64 = arith.constant 1.000000e-01 : f32
    %142 = vector.broadcast %cst_64 : f32 to vector<8x128xf32>
    %143 = arith.mulf %142, %141 : vector<8x128xf32>
    %144 = arith.addf %0, %143 : vector<8x128xf32>
    %c0_65 = arith.constant 0 : index
    %c0_66 = arith.constant 0 : index
    %145 = vector.load %arg16[%c0_65, %c0_66] : memref<8x128xf32, #tpu.memory_space<vmem>>, vector<8x128xf32>
    tpu.vector_store %arg16[%c0_65, %c0_66], %144 {strides = array<i32>} : memref<8x128xf32, #tpu.memory_space<vmem>>, vector<8x128xf32>,
    return
  }
  func.func @transform_0(%arg0: i32) -> (i32, i32) {
    %c0_i32 = arith.constant 0 : i32
    %c0_i32_0 = arith.constant 0 : i32
    %c0_i32_1 = arith.constant 0 : i32
    return %c0_i32, %c0_i32_0 : i32, i32
  }
  func.func @transform_1(%arg0: i32) -> (i32, i32) {
    %c0_i32 = arith.constant 0 : i32
    %c0_i32_0 = arith.constant 0 : i32
    %c0_i32_1 = arith.constant 0 : i32
    return %c0_i32, %c0_i32_0 : i32, i32
  }
  func.func @transform_2(%arg0: i32) -> (i32, i32) {
    %c0_i32 = arith.constant 0 : i32
    %c0_i32_0 = arith.constant 0 : i32
    %c0_i32_1 = arith.constant 0 : i32
    return %c0_i32, %c0_i32_0 : i32, i32
  }
  func.func @transform_3(%arg0: i32) -> (i32, i32) {
    %c0_i32 = arith.constant 0 : i32
    %c0_i32_0 = arith.constant 0 : i32
    %c0_i32_1 = arith.constant 0 : i32
    return %c0_i32, %c0_i32_0 : i32, i32
  }
  func.func @transform_4(%arg0: i32) -> (i32, i32) {
    %c0_i32 = arith.constant 0 : i32
    %c0_i32_0 = arith.constant 0 : i32
    %c0_i32_1 = arith.constant 0 : i32
    return %c0_i32, %c0_i32_0 : i32, i32
  }
  func.func @transform_5(%arg0: i32) -> (i32, i32) {
    %c0_i32 = arith.constant 0 : i32
    %c0_i32_0 = arith.constant 0 : i32
    %c0_i32_1 = arith.constant 0 : i32
    return %c0_i32, %c0_i32_0 : i32, i32
  }
  func.func @transform_6(%arg0: i32) -> (i32, i32) {
    %c0_i32 = arith.constant 0 : i32
    %c0_i32_0 = arith.constant 0 : i32
    %c0_i32_1 = arith.constant 0 : i32
    return %c0_i32, %c0_i32_0 : i32, i32
  }
  func.func @transform_7(%arg0: i32) -> (i32, i32) {
    %c0_i32 = arith.constant 0 : i32
    %c0_i32_0 = arith.constant 0 : i32
    %c0_i32_1 = arith.constant 0 : i32
    return %c0_i32, %c0_i32_0 : i32, i32
  }
  func.func @transform_8(%arg0: i32) -> (i32, i32) {
    %c0_i32 = arith.constant 0 : i32
    %c0_i32_0 = arith.constant 0 : i32
    %c0_i32_1 = arith.constant 0 : i32
    return %c0_i32, %c0_i32_0 : i32, i32
  }
  func.func @transform_9(%arg0: i32) -> (i32, i32) {
    %c0_i32 = arith.constant 0 : i32
    %c0_i32_0 = arith.constant 0 : i32
    %c0_i32_1 = arith.constant 0 : i32
    return %c0_i32, %c0_i32_0 : i32, i32
  }
  func.func @transform_10(%arg0: i32) -> (i32, i32) {
    %c0_i32 = arith.constant 0 : i32
    %c0_i32_0 = arith.constant 0 : i32
    %c0_i32_1 = arith.constant 0 : i32
    return %c0_i32, %c0_i32_0 : i32, i32
  }
  func.func @transform_11(%arg0: i32) -> (i32, i32) {
    %c0_i32 = arith.constant 0 : i32
    %c0_i32_0 = arith.constant 0 : i32
    %c0_i32_1 = arith.constant 0 : i32
    return %c0_i32, %c0_i32_0 : i32, i32
  }
  func.func @transform_12(%arg0: i32) -> (i32, i32) {
    %c0_i32 = arith.constant 0 : i32
    %c0_i32_0 = arith.constant 0 : i32
    %c0_i32_1 = arith.constant 0 : i32
    return %c0_i32, %c0_i32_0 : i32, i32
  }
  func.func @transform_13(%arg0: i32) -> (i32, i32) {
    %c0_i32 = arith.constant 0 : i32
    %c0_i32_0 = arith.constant 0 : i32
    %c0_i32_1 = arith.constant 0 : i32
    return %c0_i32, %c0_i32_0 : i32, i32
  }
  func.func @transform_14(%arg0: i32) -> (i32, i32) {
    %c0_i32 = arith.constant 0 : i32
    %c0_i32_0 = arith.constant 0 : i32
    %c0_i32_1 = arith.constant 0 : i32
    return %c0_i32, %c0_i32_0 : i32, i32
  }
  func.func @transform_15(%arg0: i32) -> (i32, i32) {
    %c0_i32 = arith.constant 0 : i32
    %c0_i32_0 = arith.constant 0 : i32
    %c0_i32_1 = arith.constant 0 : i32
    return %c0_i32, %c0_i32_0 : i32, i32
  }
}

</mosaic_0001>

<bundles_post_ra>
// kernel: tpu_custom_call.1
= control target key start
LH: loop header
LB: loop body
LE: loop exit
PB: predicated region body
PF: predicated region fallthrough
CT: control target
= control target key end

     0   :  { %20 = vsyncpa [#allocation3], 0  ;;  %s1440_s0 = inlined_call_operand.hbm [shape: f32[8,128], index: 0, kind: input, shape index: {}]   ;;  %s1441_s1 = inlined_call_operand.hbm [shape: f32[128,128], index: 1, kind: input, shape index: {}]   ;;  %s1442_s2 = inlined_call_operand.vmem [shape: f32[1,128], index: 2, kind: input, shape index: {}]   ;;  %s1443_s3 = inlined_call_operand.vmem [shape: f32[1,128], index: 3, kind: input, shape index: {}]   ;;  %s1444_s4 = inlined_call_operand.vmem [shape: f32[1,128], index: 4, kind: input, shape index: {}]   ;;  %s1445_s5 = inlined_call_operand.hbm [shape: f32[128,128], index: 5, kind: input, shape index: {}]   ;;  %s1446_s6 = inlined_call_operand.vmem [shape: f32[1,128], index: 6, kind: input, shape index: {}]   ;;  %s1447_s7 = inlined_call_operand.vmem [shape: f32[1,128], index: 7, kind: input, shape index: {}]   ;;  %s1448_s8 = inlined_call_operand.vmem [shape: f32[1,128], index: 8, kind: input, shape index: {}]   ;;  %s1449_s9 = inlined_call_operand.hbm [shape: f32[128,128], index: 9, kind: input, shape index: {}]   ;;  %s1450_s10 = inlined_call_operand.vmem [shape: f32[1,128], index: 10, kind: input, shape index: {}]   ;;  %s1451_s11 = inlined_call_operand.vmem [shape: f32[1,128], index: 11, kind: input, shape index: {}]   ;;  %s1452_s12 = inlined_call_operand.vmem [shape: f32[1,128], index: 12, kind: input, shape index: {}]   ;;  %s1453_s13 = inlined_call_operand.hbm [shape: f32[128,128], index: 13, kind: input, shape index: {}]   ;;  %s1454_s14 = inlined_call_operand.hbm [shape: f32[128,128], index: 14, kind: input, shape index: {}]   ;;  %s1455_s15 = inlined_call_operand.hbm [shape: f32[8,128], index: 15, kind: output, shape index: {}]  }
   0x1   :  { %21 = vsyncpa [#allocation6], 0 }
   0x2   :  { %22 = vsyncpa [#allocation9], 0 }
   0x3   :  { %23 = vsyncpa [#allocation12], 0 }
   0x4   :  { %24 = vsyncpa [#allocation4], 0  ;;  %s1187_s18 = smov [#allocation5]  }
   0x5   :  { %s40_s19 = sshll.u32 %s1187_s18, 4  ;;  %s41_s19 = int_to_ptr.vmem [resolvable:$true] %s40_s19 }
   0x6   :  { %s1045_s20 = scalar_lea.vmem %s41_s19, 2048  ;;  %p1050_p1 = scmp.lt.s32.totalorder %s41_s19, %s41_s19 }
   0x7   :  { %p1046_p0 = scmp.ne.s32.totalorder %s41_s19, %s1045_s20  ;;  %p1051_p2 = scmp.lt.s32.totalorder %s1045_s20, %s1045_s20 }
   0x9   :  { %p1052_p3 = por %p1051_p2, %p1050_p1 }
   0xb   :  { %p1053_p4 = pnand %p1052_p3, %p1046_p0 }
   0xd   :  { %1056 = shalt.err (!%p1053_p4)
}
   0xe   :  { %s1188_s21 = smov 128   ;;  %s1189_s22 = smov 8  }
   0xf   :  { %46 = dma.hbm_to_vmem [thread:$0]  %s1441_s1, 2048, %s41_s19, [#allocation6], %s1188_s21, %s1188_s21, %s1189_s22  }
  0x10   :  { %s1190_s25 = smov [#allocation8]   ;;  %s1191_s27 = smov [#allocation2]  }
  0x11   :  { %s76_s26 = sshll.u32 %s1190_s25, 4  ;;  %s31_s28 = sshll.u32 %s1191_s27, 4  ;;  %s77_s26 = int_to_ptr.vmem [resolvable:$true] %s76_s26  ;;  %s32_s28 = int_to_ptr.vmem [resolvable:$true] %s31_s28 }
  0x12   :  { %s1065_s29 = scalar_lea.vmem %s77_s26, 2048  ;;  %p1070_p6 = scmp.lt.s32.totalorder %s77_s26, %s77_s26 }
  0x13   :  { %p1066_p5 = scmp.ne.s32.totalorder %s77_s26, %s1065_s29  ;;  %p1071_p7 = scmp.lt.s32.totalorder %s1065_s29, %s1065_s29 }
  0x15   :  { %p1072_p8 = por %p1071_p7, %p1070_p6 }
  0x17   :  { %p1073_p9 = pnand %p1072_p8, %p1066_p5 }
  0x19   :  { %1076 = shalt.err (!%p1073_p9)
}
  0x1a   :  { %82 = dma.hbm_to_vmem [thread:$0]  %s1449_s9, 2048, %s77_s26, [#allocation9], %s1188_s21, %s1188_s21, %s1189_s22  }
  0x1b   :  { %s1085_s1 = scalar_lea.vmem %s32_s28, 128  ;;  %p1090_p11 = scmp.lt.s32.totalorder %s32_s28, %s32_s28 }
  0x1c   :  { %p1086_p10 = scmp.ne.s32.totalorder %s32_s28, %s1085_s1  ;;  %p1091_p12 = scmp.lt.s32.totalorder %s1085_s1, %s1085_s1 }
  0x1e   :  { %p1092_p13 = por %p1091_p12, %p1090_p11 }
  0x20   :  { %p1093_p0 = pnand %p1092_p13, %p1086_p10 }
  0x22   :  { %1096 = shalt.err (!%p1093_p0)
}
  0x23   :  { %34 = dma.hbm_to_vmem [thread:$0]  %s1440_s0, 128, %s32_s28, [#allocation3]  }
  0x24   :  { %s1192_s19 = smov [#allocation7]   ;;  %s1193_s23 = smov [#allocation10]  }
  0x25   :  { %s58_s20 = sshll.u32 %s1192_s19, 4  ;;  %s94_s24 = sshll.u32 %s1193_s23, 4  ;;  %s59_s20 = int_to_ptr.vmem [resolvable:$true] %s58_s20  ;;  %s95_s24 = int_to_ptr.vmem [resolvable:$true] %s94_s24 }
  0x26   :  { %s1105_s25 = scalar_lea.vmem %s59_s20, 2048  ;;  %p1110_p2 = scmp.lt.s32.totalorder %s59_s20, %s59_s20 }
  0x27   :  { %p1106_p1 = scmp.ne.s32.totalorder %s59_s20, %s1105_s25  ;;  %p1111_p3 = scmp.lt.s32.totalorder %s1105_s25, %s1105_s25 }
  0x29   :  { %p1112_p4 = por %p1111_p3, %p1110_p2 }
  0x2b   :  { %p1113_p5 = pnand %p1112_p4, %p1106_p1 }
  0x2d   :  { %1116 = shalt.err (!%p1113_p5)
}
  0x2e   :  { %64 = dma.hbm_to_vmem [thread:$0]  %s1445_s5, 2048, %s59_s20, [#allocation6], %s1188_s21, %s1188_s21, %s1189_s22  }
  0x2f   :  { %s1125_s0 = scalar_lea.vmem %s95_s24, 2048  ;;  %p1130_p7 = scmp.lt.s32.totalorder %s95_s24, %s95_s24 }
  0x30   :  { %p1126_p6 = scmp.ne.s32.totalorder %s95_s24, %s1125_s0  ;;  %p1131_p8 = scmp.lt.s32.totalorder %s1125_s0, %s1125_s0 }
  0x32   :  { %p1132_p9 = por %p1131_p8, %p1130_p7 }
  0x34   :  { %p1133_p10 = pnand %p1132_p9, %p1126_p6 }
  0x36   :  { %1136 = shalt.err (!%p1133_p10)
}
  0x37   :  { %100 = dma.hbm_to_vmem [thread:$0]  %s1453_s13, 2048, %s95_s24, [#allocation9], %s1188_s21, %s1188_s21, %s1189_s22  }
  0x38   :  { %s1194_s29 = smov [#allocation11]  }
  0x39   :  { %s106_s30 = sshll.u32 %s1194_s29, 4  ;;  %s107_s30 = int_to_ptr.vmem [resolvable:$true] %s106_s30 }
  0x3a   :  { %s1145_s16 = scalar_lea.vmem %s107_s30, 2048  ;;  %p1150_p12 = scmp.lt.s32.totalorder %s107_s30, %s107_s30 }
  0x3b   :  { %p1146_p11 = scmp.ne.s32.totalorder %s107_s30, %s1145_s16  ;;  %p1151_p13 = scmp.lt.s32.totalorder %s1145_s16, %s1145_s16 }
  0x3d   :  { %p1152_p0 = por %p1151_p13, %p1150_p12 }
  0x3f   :  { %p1153_p1 = pnand %p1152_p0, %p1146_p11 }
  0x41   :  { %1156 = shalt.err (!%p1153_p1)
}
  0x42   :  { %112 = dma.hbm_to_vmem [thread:$0]  %s1454_s14, 2048, %s107_s30, [#allocation12], %s1188_s21, %s1188_s21, %s1189_s22  }
  0x43   :  { %1177 = dma.done.wait [#allocation3], 128  }
  0x44   :  { %1178 = vsyncadd [#allocation3], 4294967168 }
  0x45   :  { %1179 = dma.done.wait [#allocation6], 4096  }
  0x46   :  { %1180 = vsyncadd [#allocation6], 4294963200 }
  0x47   :  { %1181 = dma.done.wait [#allocation9], 4096  }
  0x48   :  { %1182 = vsyncadd [#allocation9], 4294963200 }
  0x49   :  { %1183 = dma.done.wait [#allocation12], 2048  }
  0x4a   :  { %1184 = vsyncadd [#allocation12], 4294965248  ;;  %v1195_v0 = vmov 0.0   ;;  %vm1196_vm0 = vmmov 0   ;;  %v150_v1 = vld [vmem:[#allocation5 + $0x78] sm:$0xff]  ;;  %v149_v2 = vld [vmem:[#allocation5 + $0x70] sm:$0xff]  ;;  %v254_v55 = vlaneseq }
  0x4b   :  { %833 = vmatprep.subr.mxu0 %v1195_v0  ;;  %865 = vmatprep.mubr.msk.f32.mxu0 %vm1196_vm0, %v1195_v0  ;;  %v148_v3 = vld [vmem:[#allocation5 + $0x68] sm:$0xff]  ;;  %v147_v4 = vld [vmem:[#allocation5 + $0x60] sm:$0xff]  ;;  %v146_v5 = vld [vmem:[#allocation5 + $0x58] sm:$0xff] }
  0x4c   :  { %868 = vmatprep.subr.mxu1 %v1195_v0  ;;  %900 = vmatprep.mubr.msk.f32.mxu1 %vm1196_vm0, %v1195_v0  ;;  %v145_v6 = vld [vmem:[#allocation5 + $0x50] sm:$0xff]  ;;  %v144_v7 = vld [vmem:[#allocation5 + $0x48] sm:$0xff]  ;;  %v143_v8 = vld [vmem:[#allocation5 + $0x40] sm:$0xff]  ;;  %v255_v56 = vshrl.u32 %v254_v55, 7 }
  0x4d   :  { %834 = vmatpush3.msra.mxu0 %v150_v1  ;;  %v142_v9 = vld [vmem:[#allocation5 + $0x38] sm:$0xff]  ;;  %v141_v10 = vld [vmem:[#allocation5 + $0x30] sm:$0xff]  ;;  %v140_v11 = vld [vmem:[#allocation5 + $0x28] sm:$0xff] }
  0x4e   :  { %835 = vmatprep.subr.mxu0 %v1195_v0  ;;  %v139_v12 = vld [vmem:[#allocation5 + $0x20] sm:$0xff]  ;;  %v138_v13 = vld [vmem:[#allocation5 + $0x18] sm:$0xff]  ;;  %v137_v14 = vld [vmem:[#allocation5 + $0x10] sm:$0xff]  ;;  %v1360_v58 = vsub.s32 0, %v255_v56 }
  0x4f   :  { %836 = vmatpush3.msra.mxu0 %v149_v2  ;;  %v136_v15 = vld [vmem:[#allocation5 + $0x8] sm:$0xff]  ;;  %v135_v16 = vld [vmem:[#allocation5] sm:$0xff]  ;;  %v1331_v17 = vld [vmem:[#allocation2] sm:$0xff] }
  0x50   :  { %837 = vmatprep.subr.mxu0 %v1195_v0  ;;  %v289_v18 = vld [vmem:[#allocation7 + $0x78] sm:$0xff]  ;;  %v288_v19 = vld [vmem:[#allocation7 + $0x70] sm:$0xff]  ;;  %v287_v20 = vld [vmem:[#allocation7 + $0x68] sm:$0xff] }
  0x51   :  { %838 = vmatpush3.msra.mxu0 %v148_v3  ;;  %869 = vmatpush3.msra.mxu1 %v289_v18  ;;  %v286_v21 = vld [vmem:[#allocation7 + $0x60] sm:$0xff]  ;;  %v285_v22 = vld [vmem:[#allocation7 + $0x58] sm:$0xff]  ;;  %v284_v23 = vld [vmem:[#allocation7 + $0x50] sm:$0xff] }
  0x52   :  { %839 = vmatprep.subr.mxu0 %v1195_v0  ;;  %870 = vmatprep.subr.mxu1 %v1195_v0  ;;  %v283_v24 = vld [vmem:[#allocation7 + $0x48] sm:$0xff]  ;;  %v282_v25 = vld [vmem:[#allocation7 + $0x40] sm:$0xff]  ;;  %v281_v26 = vld [vmem:[#allocation7 + $0x38] sm:$0xff] }
  0x53   :  { %840 = vmatpush3.msra.mxu0 %v147_v4  ;;  %871 = vmatpush3.msra.mxu1 %v288_v19  ;;  %v280_v27 = vld [vmem:[#allocation7 + $0x30] sm:$0xff]  ;;  %v279_v28 = vld [vmem:[#allocation7 + $0x28] sm:$0xff]  ;;  %v278_v29 = vld [vmem:[#allocation7 + $0x20] sm:$0xff] }
  0x54   :  { %841 = vmatprep.subr.mxu0 %v1195_v0  ;;  %872 = vmatprep.subr.mxu1 %v1195_v0  ;;  %v277_v30 = vld [vmem:[#allocation7 + $0x18] sm:$0xff]  ;;  %v276_v31 = vld [vmem:[#allocation7 + $0x10] sm:$0xff]  ;;  %v275_v32 = vld [vmem:[#allocation7 + $0x8] sm:$0xff] }
  0x55   :  { %842 = vmatpush3.msra.mxu0 %v146_v5  ;;  %873 = vmatpush3.msra.mxu1 %v287_v20  ;;  %v274_v33 = vld [vmem:[#allocation7] sm:$0xff]  ;;  %v742_v34 = vld [vmem:[%s1442_s2] ss:$0 sm:$0xff]  ;;  %v417_v18 = vld [vmem:[#allocation8 + $0x30] sm:$0xff] }
  0x56   :  { %843 = vmatprep.subr.mxu0 %v1195_v0  ;;  %874 = vmatprep.subr.mxu1 %v1195_v0  ;;  %v228_v57 = vld [vmem:[%s1443_s3] sm:$0x1]  ;;  %v416_v19 = vld [vmem:[#allocation8 + $0x28] sm:$0xff]  ;;  %v415_v20 = vld [vmem:[#allocation8 + $0x20] sm:$0xff] }
  0x57   :  { %844 = vmatpush3.msra.mxu0 %v145_v6  ;;  %875 = vmatpush3.msra.mxu1 %v286_v21  ;;  %v743_v62 = vld [vmem:[%s1444_s4] ss:$0 sm:$0xff] }
  0x58   :  { %845 = vmatprep.subr.mxu0 %v1195_v0  ;;  %876 = vmatprep.subr.mxu1 %v1195_v0  ;;  %v414_v21 = vld [vmem:[#allocation8 + $0x18] sm:$0xff] }
  0x59   :  { %846 = vmatpush3.msra.mxu0 %v144_v7  ;;  %877 = vmatpush3.msra.mxu1 %v285_v22  ;;  %v413_v22 = vld [vmem:[#allocation8 + $0x10] sm:$0xff] }
  0x5a   :  { %847 = vmatprep.subr.mxu0 %v1195_v0  ;;  %878 = vmatprep.subr.mxu1 %v1195_v0 }
  0x5b   :  { %848 = vmatpush3.msra.mxu0 %v143_v8  ;;  %879 = vmatpush3.msra.mxu1 %v284_v23  ;;  %v426_v8 = vld [vmem:[#allocation8 + $0x78] sm:$0xff]  ;;  %v412_v23 = vld [vmem:[#allocation8 + $0x8] sm:$0xff] }
  0x5c   :  { %849 = vmatprep.subr.mxu0 %v1195_v0  ;;  %880 = vmatprep.subr.mxu1 %v1195_v0 }
  0x5d   :  { %850 = vmatpush3.msra.mxu0 %v142_v9  ;;  %881 = vmatpush3.msra.mxu1 %v283_v24  ;;  %v425_v9 = vld [vmem:[#allocation8 + $0x70] sm:$0xff]  ;;  %v411_v24 = vld [vmem:[#allocation8] sm:$0xff] }
  0x5e   :  { %851 = vmatprep.subr.mxu0 %v1195_v0  ;;  %882 = vmatprep.subr.mxu1 %v1195_v0 }
  0x5f   :  { %852 = vmatpush3.msra.mxu0 %v141_v10  ;;  %883 = vmatpush3.msra.mxu1 %v282_v25  ;;  %v424_v10 = vld [vmem:[#allocation8 + $0x68] sm:$0xff]  ;;  %v744_v25 = vld [vmem:[%s1446_s6] ss:$0 sm:$0xff] }
  0x60   :  { %853 = vmatprep.subr.mxu0 %v1195_v0  ;;  %884 = vmatprep.subr.mxu1 %v1195_v0 }
  0x61   :  { %854 = vmatpush3.msra.mxu0 %v140_v11  ;;  %885 = vmatpush3.msra.mxu1 %v281_v26  ;;  %v423_v11 = vld [vmem:[#allocation8 + $0x60] sm:$0xff] }
  0x62   :  { %855 = vmatprep.subr.mxu0 %v1195_v0  ;;  %886 = vmatprep.subr.mxu1 %v1195_v0 }
  0x63   :  { %856 = vmatpush3.msra.mxu0 %v139_v12  ;;  %887 = vmatpush3.msra.mxu1 %v280_v27  ;;  %v422_v12 = vld [vmem:[#allocation8 + $0x58] sm:$0xff] }
  0x64   :  { %857 = vmatprep.subr.mxu0 %v1195_v0  ;;  %888 = vmatprep.subr.mxu1 %v1195_v0 }
  0x65   :  { %858 = vmatpush3.msra.mxu0 %v138_v13  ;;  %889 = vmatpush3.msra.mxu1 %v279_v28  ;;  %v421_v13 = vld [vmem:[#allocation8 + $0x50] sm:$0xff] }
  0x66   :  { %859 = vmatprep.subr.mxu0 %v1195_v0  ;;  %890 = vmatprep.subr.mxu1 %v1195_v0 }
  0x67   :  { %860 = vmatpush3.msra.mxu0 %v137_v14  ;;  %891 = vmatpush3.msra.mxu1 %v278_v29  ;;  %v420_v14 = vld [vmem:[#allocation8 + $0x48] sm:$0xff] }
  0x68   :  { %861 = vmatprep.subr.mxu0 %v1195_v0  ;;  %892 = vmatprep.subr.mxu1 %v1195_v0 }
  0x69   :  { %862 = vmatpush3.msra.mxu0 %v136_v15  ;;  %893 = vmatpush3.msra.mxu1 %v277_v30  ;;  %v419_v15 = vld [vmem:[#allocation8 + $0x40] sm:$0xff] }
  0x6a   :  { %863 = vmatprep.subr.mxu0 %v1195_v0  ;;  %894 = vmatprep.subr.mxu1 %v1195_v0 }
  0x6b   :  { %864 = vmatpush3.msra.mxu0 %v135_v16  ;;  %895 = vmatpush3.msra.mxu1 %v276_v31  ;;  %v418_v16 = vld [vmem:[#allocation8 + $0x38] sm:$0xff] }
  0x6c   :  { %866 = vmatmul.mubr.f32.vlgmr.msra.gmra.mxu0 %v1331_v17  ;;  %903 = vmatprep.subr.mxu0 %v1195_v0 }
  0x6d   :  { %935 = vmatprep.mubr.msk.f32.mxu0 %vm1196_vm0, %v1195_v0  ;;  %896 = vmatprep.subr.mxu1 %v1195_v0 }
  0x6e   :  { %897 = vmatpush3.msra.mxu1 %v275_v32  ;;  %904 = vmatpush3.msra.mxu0 %v426_v8  ;;  %v545_v8 = vld [vmem:[#allocation10 + $0x20] sm:$0xff] }
  0x6f   :  { %898 = vmatprep.subr.mxu1 %v1195_v0  ;;  %905 = vmatprep.subr.mxu0 %v1195_v0 }
  0x70   :  { %899 = vmatpush3.msra.mxu1 %v274_v33  ;;  %906 = vmatpush3.msra.mxu0 %v425_v9  ;;  %v544_v9 = vld [vmem:[#allocation10 + $0x18] sm:$0xff] }
  0x71   :  { %938 = vmatprep.subr.mxu1 %v1195_v0  ;;  %907 = vmatprep.subr.mxu0 %v1195_v0 }
  0x72   :  { %908 = vmatpush3.msra.mxu0 %v424_v10  ;;  %v543_v10 = vld [vmem:[#allocation10 + $0x10] sm:$0xff] }
  0x73   :  { %909 = vmatprep.subr.mxu0 %v1195_v0 }
  0x74   :  { %910 = vmatpush3.msra.mxu0 %v423_v11  ;;  %v542_v11 = vld [vmem:[#allocation10 + $0x8] sm:$0xff] }
  0x75   :  { %911 = vmatprep.subr.mxu0 %v1195_v0 }
  0x76   :  { %912 = vmatpush3.msra.mxu0 %v422_v12  ;;  %v541_v12 = vld [vmem:[#allocation10] sm:$0xff] }
  0x77   :  { %913 = vmatprep.subr.mxu0 %v1195_v0 }
  0x78   :  { %914 = vmatpush3.msra.mxu0 %v421_v13  ;;  %v643_v13 = vld [vmem:[#allocation11 + $0x78] sm:$0xff] }
  0x79   :  { %915 = vmatprep.subr.mxu0 %v1195_v0 }
  0x7a   :  { %916 = vmatpush3.msra.mxu0 %v420_v14  ;;  %v642_v14 = vld [vmem:[#allocation11 + $0x70] sm:$0xff] }
  0x7b   :  { %917 = vmatprep.subr.mxu0 %v1195_v0 }
  0x7c   :  { %918 = vmatpush3.msra.mxu0 %v419_v15  ;;  %v641_v15 = vld [vmem:[#allocation11 + $0x68] sm:$0xff] }
  0x7d   :  { %919 = vmatprep.subr.mxu0 %v1195_v0 }
  0x7e   :  { %920 = vmatpush3.msra.mxu0 %v418_v16  ;;  %v640_v16 = vld [vmem:[#allocation11 + $0x60] sm:$0xff] }
  0x7f   :  { %921 = vmatprep.subr.mxu0 %v1195_v0 }
  0x80   :  { %922 = vmatpush3.msra.mxu0 %v417_v18  ;;  %v639_v18 = vld [vmem:[#allocation11 + $0x58] sm:$0xff] }
  0x81   :  { %923 = vmatprep.subr.mxu0 %v1195_v0 }
  0x82   :  { %924 = vmatpush3.msra.mxu0 %v416_v19  ;;  %v638_v19 = vld [vmem:[#allocation11 + $0x50] sm:$0xff] }
  0x83   :  { %925 = vmatprep.subr.mxu0 %v1195_v0 }
  0x84   :  { %926 = vmatpush3.msra.mxu0 %v415_v20  ;;  %v637_v20 = vld [vmem:[#allocation11 + $0x48] sm:$0xff] }
  0x85   :  { %927 = vmatprep.subr.mxu0 %v1195_v0 }
  0x86   :  { %928 = vmatpush3.msra.mxu0 %v414_v21  ;;  %v636_v21 = vld [vmem:[#allocation11 + $0x40] sm:$0xff] }
  0x87   :  { %929 = vmatprep.subr.mxu0 %v1195_v0 }
  0x88   :  { %930 = vmatpush3.msra.mxu0 %v413_v22  ;;  %v635_v22 = vld [vmem:[#allocation11 + $0x38] sm:$0xff] }
  0x89   :  { %931 = vmatprep.subr.mxu0 %v1195_v0 }
  0x8a   :  { %932 = vmatpush3.msra.mxu0 %v412_v23  ;;  %v634_v23 = vld [vmem:[#allocation11 + $0x30] sm:$0xff] }
  0x8b   :  { %933 = vmatprep.subr.mxu0 %v1195_v0 }
  0x8c   :  { %934 = vmatpush3.msra.mxu0 %v411_v24  ;;  %v633_v24 = vld [vmem:[#allocation11 + $0x28] sm:$0xff] }
  0x8d   :  { %973 = vmatprep.subr.mxu0 %v1195_v0 }
 0x12c   :  { %v224_v35 = vpop.f32.mrf.mxu0 }
 0x12d   :  { %v225_v36 = vadd.f32 %v742_v34, %v224_v35 }
 0x12e   :  { %v867_v37 = vpop.f32.mrf.mxu0 }
 0x12f   :  { %v233_v38 = vrot.slane %v225_v36, 4 }
 0x131   :  { %v234_v39 = vadd.f32 %v233_v38, %v225_v36 }
 0x133   :  { %v235_v40 = vrot.slane %v234_v39, 2 }
 0x135   :  { %v236_v41 = vadd.f32 %v235_v40, %v234_v39 }
 0x137   :  { %v237_v42 = vrot.slane %v236_v41, 1 }
 0x139   :  { %v238_v43 = vadd.f32 %v237_v42, %v236_v41 }
 0x13b   :  { %v239_v44 = vmul.f32 0.125, %v238_v43 }
 0x13d   :  { %v240_v45 = vsub.f32 %v225_v36, %v239_v44 }
 0x13f   :  { %v242_v46 = vmul.f32 %v240_v45, %v240_v45 }
 0x141   :  { %v243_v47 = vrot.slane %v242_v46, 4 }
 0x143   :  { %v244_v48 = vadd.f32 %v243_v47, %v242_v46  ;;  %v367_v46 = vld [vmem:[%s1447_s7] sm:$0x1] }
 0x145   :  { %v245_v49 = vrot.slane %v244_v48, 2 }
 0x147   :  { %v246_v50 = vadd.f32 %v245_v49, %v244_v48 }
 0x149   :  { %v247_v51 = vrot.slane %v246_v50, 1 }
 0x14b   :  { %v248_v52 = vadd.f32 %v247_v51, %v246_v50  ;;  %v745_v50 = vld [vmem:[%s1448_s8] ss:$0 sm:$0xff] }
 0x14d   :  { %v249_v53 = vmul.f32 0.125, %v248_v52 }
 0x14f   :  { %v250_v54 = vadd.f32 1e-05, %v249_v53 }
 0x151   :  { %1019 = vrsqrt.f32 %v250_v54 }
 0x15e   :  { %v1020_v59 = vpop.eup %1019 }
 0x15f   :  { %v252_v60 = vmul.f32 %v1020_v59, %v228_v57 }
 0x161   :  { %v257_v61 = vrot.slane %v252_v60, %v1360_v58  ;;  %v556_v60 = vld [vmem:[#allocation10 + $0x78] sm:$0xff] }
 0x163   :  { %v259_v63 = vmul.f32 %v257_v61, %v240_v45  ;;  %v555_v61 = vld [vmem:[#allocation10 + $0x70] sm:$0xff] }
 0x165   :  { %v266_v1 = vadd.f32 %v743_v62, %v259_v63  ;;  %v554_v62 = vld [vmem:[#allocation10 + $0x68] sm:$0xff]  ;;  %v553_v63 = vld [vmem:[#allocation10 + $0x60] sm:$0xff] }
 0x167   :  { %v267_v2 = vsub.f32 0.0, %v266_v1 }
 0x169   :  { %v268_v3 = vmul.f32 1.442695, %v267_v2  ;;  %v551_v2 = vld [vmem:[#allocation10 + $0x50] sm:$0xff] }
 0x16b   :  { %1021 = vpow2.f32 %v268_v3  ;;  %v550_v3 = vld [vmem:[#allocation10 + $0x48] sm:$0xff] }
 0x178   :  { %v1022_v4 = vpop.eup %1021 }
 0x179   :  { %v270_v5 = vadd.f32 1.0, %v1022_v4  ;;  %v549_v4 = vld [vmem:[#allocation10 + $0x40] sm:$0xff] }
 0x17b   :  { %1023 = vrcp.f32 %v270_v5  ;;  %v548_v5 = vld [vmem:[#allocation10 + $0x38] sm:$0xff] }
 0x188   :  { %v1024_v6 = vpop.eup %1023 }
 0x189   :  { %v273_v7 = vmul.f32 %v1024_v6, %v266_v1  ;;  %v552_v1 = vld [vmem:[#allocation10 + $0x58] sm:$0xff]  ;;  %v547_v6 = vld [vmem:[#allocation10 + $0x30] sm:$0xff] }
 0x18b   :  { %901 = vmatmul.mubr.f32.vlgmr.msra.gmra.mxu1 %v273_v7  ;;  %v546_v7 = vld [vmem:[#allocation10 + $0x28] sm:$0xff] }
 0x18c   :  { %970 = vmatprep.mubr.msk.f32.mxu1 %vm1196_vm0, %v1195_v0  ;;  %939 = vmatpush3.msra.mxu1 %v556_v60 }
 0x18d   :  { %940 = vmatprep.subr.mxu1 %v1195_v0 }
 0x18e   :  { %941 = vmatpush3.msra.mxu1 %v555_v61 }
 0x18f   :  { %942 = vmatprep.subr.mxu1 %v1195_v0 }
 0x190   :  { %943 = vmatpush3.msra.mxu1 %v554_v62 }
 0x191   :  { %944 = vmatprep.subr.mxu1 %v1195_v0 }
 0x192   :  { %945 = vmatpush3.msra.mxu1 %v553_v63 }
 0x193   :  { %946 = vmatprep.subr.mxu1 %v1195_v0 }
 0x194   :  { %947 = vmatpush3.msra.mxu1 %v552_v1 }
 0x195   :  { %948 = vmatprep.subr.mxu1 %v1195_v0 }
 0x196   :  { %949 = vmatpush3.msra.mxu1 %v551_v2 }
 0x197   :  { %950 = vmatprep.subr.mxu1 %v1195_v0 }
 0x198   :  { %951 = vmatpush3.msra.mxu1 %v550_v3 }
 0x199   :  { %952 = vmatprep.subr.mxu1 %v1195_v0 }
 0x19a   :  { %953 = vmatpush3.msra.mxu1 %v549_v4 }
 0x19b   :  { %954 = vmatprep.subr.mxu1 %v1195_v0 }
 0x19c   :  { %955 = vmatpush3.msra.mxu1 %v548_v5 }
 0x19d   :  { %956 = vmatprep.subr.mxu1 %v1195_v0 }
 0x19e   :  { %957 = vmatpush3.msra.mxu1 %v547_v6 }
 0x19f   :  { %958 = vmatprep.subr.mxu1 %v1195_v0 }
 0x1a0   :  { %959 = vmatpush3.msra.mxu1 %v546_v7 }
 0x1a1   :  { %960 = vmatprep.subr.mxu1 %v1195_v0 }
 0x1a2   :  { %961 = vmatpush3.msra.mxu1 %v545_v8 }
 0x1a3   :  { %962 = vmatprep.subr.mxu1 %v1195_v0 }
 0x1a4   :  { %963 = vmatpush3.msra.mxu1 %v544_v9 }
 0x1a5   :  { %964 = vmatprep.subr.mxu1 %v1195_v0 }
 0x1a6   :  { %965 = vmatpush3.msra.mxu1 %v543_v10 }
 0x1a7   :  { %966 = vmatprep.subr.mxu1 %v1195_v0 }
 0x1a8   :  { %967 = vmatpush3.msra.mxu1 %v542_v11 }
 0x1a9   :  { %968 = vmatprep.subr.mxu1 %v1195_v0 }
 0x1aa   :  { %969 = vmatpush3.msra.mxu1 %v541_v12 }
 0x24b   :  { %v363_v26 = vpop.f32.mrf.mxu1 }
 0x24c   :  { %v364_v27 = vadd.f32 %v744_v25, %v363_v26  ;;  %v632_v25 = vld [vmem:[#allocation11 + $0x20] sm:$0xff]  ;;  %v631_v26 = vld [vmem:[#allocation11 + $0x18] sm:$0xff] }
 0x24d   :  { %v902_v28 = vpop.f32.mrf.mxu1 }
 0x24e   :  { %v370_v29 = vrot.slane %v364_v27, 4  ;;  %v746_v28 = vld [vmem:[%s1450_s10] ss:$0 sm:$0xff] }
 0x250   :  { %v371_v30 = vadd.f32 %v370_v29, %v364_v27 }
 0x252   :  { %v372_v31 = vrot.slane %v371_v30, 2 }
 0x254   :  { %v373_v32 = vadd.f32 %v372_v31, %v371_v30 }
 0x256   :  { %v374_v33 = vrot.slane %v373_v32, 1 }
 0x258   :  { %v375_v34 = vadd.f32 %v374_v33, %v373_v32 }
 0x25a   :  { %v376_v35 = vmul.f32 0.125, %v375_v34 }
 0x25c   :  { %v377_v36 = vsub.f32 %v364_v27, %v376_v35  ;;  %v630_v27 = vld [vmem:[#allocation11 + $0x10] sm:$0xff] }
 0x25e   :  { %v379_v37 = vmul.f32 %v377_v36, %v377_v36 }
 0x260   :  { %v380_v38 = vrot.slane %v379_v37, 4 }
 0x262   :  { %v381_v39 = vadd.f32 %v380_v38, %v379_v37 }
 0x264   :  { %v382_v40 = vrot.slane %v381_v39, 2 }
 0x266   :  { %v383_v41 = vadd.f32 %v382_v40, %v381_v39 }
 0x268   :  { %v384_v42 = vrot.slane %v383_v41, 1 }
 0x26a   :  { %v385_v43 = vadd.f32 %v384_v42, %v383_v41 }
 0x26c   :  { %v386_v44 = vmul.f32 0.125, %v385_v43 }
 0x26e   :  { %v387_v45 = vadd.f32 1e-05, %v386_v44 }
 0x270   :  { %1025 = vrsqrt.f32 %v387_v45 }
 0x27d   :  { %v1026_v47 = vpop.eup %1025 }
 0x27e   :  { %v389_v48 = vmul.f32 %v1026_v47, %v367_v46 }
 0x280   :  { %v394_v49 = vrot.slane %v389_v48, %v1360_v58 }
 0x282   :  { %v396_v51 = vmul.f32 %v394_v49, %v377_v36  ;;  %v504_v49 = vld [vmem:[%s1451_s11] sm:$0x1]  ;;  %s1197_s11 = smov [#allocation13]  }
 0x284   :  { %v403_v52 = vadd.f32 %v745_v50, %v396_v51 }
 0x286   :  { %v404_v53 = vsub.f32 0.0, %v403_v52 }
 0x288   :  { %v405_v54 = vmul.f32 1.442695, %v404_v53  ;;  %v747_v53 = vld [vmem:[%s1452_s12] ss:$0 sm:$0xff]  ;;  %s730_s12 = sshll.u32 %s1197_s11, 4  ;;  %s731_s12 = int_to_ptr.vmem [resolvable:$true] %s730_s12 }
 0x289   :  { %s1157_s9 = scalar_lea.vmem %s731_s12, 128  ;;  %p1162_p3 = scmp.lt.s32.totalorder %s731_s12, %s731_s12 }
 0x28a   :  { %1027 = vpow2.f32 %v405_v54  ;;  %p1158_p2 = scmp.ne.s32.totalorder %s731_s12, %s1157_s9  ;;  %p1163_p4 = scmp.lt.s32.totalorder %s1157_s9, %s1157_s9 }
 0x28c   :  { %p1164_p5 = por %p1163_p4, %p1162_p3 }
 0x28e   :  { %p1165_p6 = pnand %p1164_p5, %p1158_p2 }
 0x297   :  { %v1028_v55 = vpop.eup %1027 }
 0x298   :  { %v407_v56 = vadd.f32 1.0, %v1028_v55 }
 0x29a   :  { %1029 = vrcp.f32 %v407_v56  ;;  %v629_v56 = vld [vmem:[#allocation11 + $0x8] sm:$0xff] }
 0x2a7   :  { %v1030_v57 = vpop.eup %1029 }
 0x2a8   :  { %v410_v59 = vmul.f32 %v1030_v57, %v403_v52  ;;  %v628_v57 = vld [vmem:[#allocation11] sm:$0xff] }
 0x2aa   :  { %936 = vmatmul.mubr.f32.vlgmr.msra.gmra.mxu0 %v410_v59 }
 0x2ab   :  { %1005 = vmatprep.mubr.msk.f32.mxu0 %vm1196_vm0, %v1195_v0  ;;  %974 = vmatpush3.msra.mxu0 %v643_v13 }
 0x2ac   :  { %975 = vmatprep.subr.mxu0 %v1195_v0 }
 0x2ad   :  { %976 = vmatpush3.msra.mxu0 %v642_v14 }
 0x2ae   :  { %977 = vmatprep.subr.mxu0 %v1195_v0 }
 0x2af   :  { %978 = vmatpush3.msra.mxu0 %v641_v15 }
 0x2b0   :  { %979 = vmatprep.subr.mxu0 %v1195_v0 }
 0x2b1   :  { %980 = vmatpush3.msra.mxu0 %v640_v16 }
 0x2b2   :  { %981 = vmatprep.subr.mxu0 %v1195_v0 }
 0x2b3   :  { %982 = vmatpush3.msra.mxu0 %v639_v18 }
 0x2b4   :  { %983 = vmatprep.subr.mxu0 %v1195_v0 }
 0x2b5   :  { %984 = vmatpush3.msra.mxu0 %v638_v19 }
 0x2b6   :  { %985 = vmatprep.subr.mxu0 %v1195_v0 }
 0x2b7   :  { %986 = vmatpush3.msra.mxu0 %v637_v20 }
 0x2b8   :  { %987 = vmatprep.subr.mxu0 %v1195_v0 }
 0x2b9   :  { %988 = vmatpush3.msra.mxu0 %v636_v21 }
 0x2ba   :  { %989 = vmatprep.subr.mxu0 %v1195_v0 }
 0x2bb   :  { %990 = vmatpush3.msra.mxu0 %v635_v22 }
 0x2bc   :  { %991 = vmatprep.subr.mxu0 %v1195_v0 }
 0x2bd   :  { %992 = vmatpush3.msra.mxu0 %v634_v23 }
 0x2be   :  { %993 = vmatprep.subr.mxu0 %v1195_v0 }
 0x2bf   :  { %994 = vmatpush3.msra.mxu0 %v633_v24 }
 0x2c0   :  { %995 = vmatprep.subr.mxu0 %v1195_v0 }
 0x2c1   :  { %996 = vmatpush3.msra.mxu0 %v632_v25 }
 0x2c2   :  { %997 = vmatprep.subr.mxu0 %v1195_v0 }
 0x2c3   :  { %998 = vmatpush3.msra.mxu0 %v631_v26 }
 0x2c4   :  { %999 = vmatprep.subr.mxu0 %v1195_v0 }
 0x2c5   :  { %1000 = vmatpush3.msra.mxu0 %v630_v27 }
 0x2c6   :  { %1001 = vmatprep.subr.mxu0 %v1195_v0 }
 0x2c7   :  { %1002 = vmatpush3.msra.mxu0 %v629_v56 }
 0x2c8   :  { %1003 = vmatprep.subr.mxu0 %v1195_v0 }
 0x2c9   :  { %1004 = vmatpush3.msra.mxu0 %v628_v57 }
 0x36a   :  { %v500_v29 = vpop.f32.mrf.mxu0 }
 0x36b   :  { %v501_v30 = vadd.f32 %v746_v28, %v500_v29 }
 0x36c   :  { %v937_v31 = vpop.f32.mrf.mxu0 }
 0x36d   :  { %v507_v32 = vrot.slane %v501_v30, 4 }
 0x36f   :  { %v508_v33 = vadd.f32 %v507_v32, %v501_v30 }
 0x371   :  { %v509_v34 = vrot.slane %v508_v33, 2 }
 0x373   :  { %v510_v35 = vadd.f32 %v509_v34, %v508_v33 }
 0x375   :  { %v511_v36 = vrot.slane %v510_v35, 1 }
 0x377   :  { %v512_v37 = vadd.f32 %v511_v36, %v510_v35 }
 0x379   :  { %v513_v38 = vmul.f32 0.125, %v512_v37 }
 0x37b   :  { %v514_v39 = vsub.f32 %v501_v30, %v513_v38 }
 0x37d   :  { %v516_v40 = vmul.f32 %v514_v39, %v514_v39 }
 0x37f   :  { %v517_v41 = vrot.slane %v516_v40, 4 }
 0x381   :  { %v518_v42 = vadd.f32 %v517_v41, %v516_v40 }
 0x383   :  { %v519_v43 = vrot.slane %v518_v42, 2 }
 0x385   :  { %v520_v44 = vadd.f32 %v519_v43, %v518_v42 }
 0x387   :  { %v521_v45 = vrot.slane %v520_v44, 1 }
 0x389   :  { %v522_v46 = vadd.f32 %v521_v45, %v520_v44 }
 0x38b   :  { %v523_v47 = vmul.f32 0.125, %v522_v46 }
 0x38d   :  { %v524_v48 = vadd.f32 1e-05, %v523_v47 }
 0x38f   :  { %1031 = vrsqrt.f32 %v524_v48 }
 0x39c   :  { %v1032_v50 = vpop.eup %1031 }
 0x39d   :  { %v526_v51 = vmul.f32 %v1032_v50, %v504_v49 }
 0x39f   :  { %v531_v52 = vrot.slane %v526_v51, %v1360_v58 }
 0x3a1   :  { %v533_v54 = vmul.f32 %v531_v52, %v514_v39 }
 0x3a3   :  { %v540_v55 = vadd.f32 %v747_v53, %v533_v54 }
 0x3a5   :  { %971 = vmatmul.mubr.f32.vlgmr.msra.gmra.mxu1 %v540_v55 }
 0x465   :  { %v623_v59 = vpop.f32.mrf.mxu1 }
 0x466   :  { %v627_v60 = vmax.f32 %v623_v59, 0.0 }
 0x467   :  { %v972_v61 = vpop.f32.mrf.mxu1 }
 0x468   :  { %1006 = vmatmul.mubr.f32.vlgmr.msra.gmra.mxu0 %v627_v60 }
 0x528   :  { %v710_v62 = vpop.f32.mrf.mxu0 }
 0x529   :  { %v714_v63 = vsub.f32 0.0, %v710_v62 }
 0x52a   :  { %v1007_v58 = vpop.f32.mrf.mxu0 }
 0x52b   :  { %v715_v1 = vmul.f32 1.442695, %v714_v63 }
 0x52d   :  { %1033 = vpow2.f32 %v715_v1 }
 0x53a   :  { %v1034_v2 = vpop.eup %1033 }
 0x53b   :  { %v717_v3 = vadd.f32 1.0, %v1034_v2 }
 0x53d   :  { %1035 = vrcp.f32 %v717_v3 }
 0x54a   :  { %v1036_v4 = vpop.eup %1035 }
 0x54b   :  { %v720_v5 = vmul.f32 %v1036_v4, %v540_v55 }
 0x54d   :  { %v721_v6 = vmul.f32 0.1, %v720_v5 }
 0x54f   :  { %v722_v0 = vadd.f32 %v721_v6, %v1331_v17 }
 0x551   :  { %723 = vst [vmem:[#allocation13] sm:$0xff] %v722_v0 }
 0x552   :  { %1168 = shalt.err (!%p1165_p6)
}
 0x553   :  { %733 = dma.vmem_to_hbm [thread:$0]  %s731_s12, 128, %s1455_s15, [#allocation4]  }
 0x554   :  { %1185 = dma.done.wait [#allocation4], 128  }
 0x555   :  { %1186 = vsyncadd [#allocation4], 4294967168 }
 0x556   :  { %737 = vsyncpa [#allocation3], 1 }
 0x557   :  { %738 = vsyncpa [#allocation6], 1 }
 0x558   :  { %739 = vsyncpa [#allocation9], 1 }
 0x559   :  { %740 = vsyncpa [#allocation12], 1 }
 0x55a   :  { %741 = vsyncpa [#allocation4], 1 }

</bundles_post_ra>
